<compile_context>
chip_gen: v5e
topology: v5e:2x2
jax: 0.10.0
libtpu: 0.0.40
codegen_flags: <defaults>
</compile_context>

<pallas_src>
import math
import functools

import jax
import jax.numpy as jnp
from jax.experimental import pallas as pl
from jax.experimental.pallas import tpu as pltpu

# ---- "config" (ModelConfig) -------------------------------------------------
D_EMBED = 32      # config.d_embed
SEQ_LEN = 8       # config.seq_len (= max_seq_len)
VOCAB = 64        # len(vocab)
BATCH = 2


# ---- Pallas kernel ----------------------------------------------------------
def _embed_kernel(ids_ref, emb_ref, pos_ref, out_ref, *, scale):
    # ids_ref : SMEM (N,)      int32  token ids (consumed by index_maps; unused here)
    # emb_ref : VMEM (1, 1, D) f32    gathered embedding-table row for this token
    # pos_ref : VMEM (TR, D)   f32    positional-encoding rows for this row tile
    # out_ref : VMEM (TR, D)   f32    output rows (resident across the inner axis)
    del ids_ref
    i = pl.program_id(1)                                    # row within the current tile
    row = emb_ref[0] * jnp.float32(scale) + pos_ref[pl.ds(i, 1), :]   # (1, D) f32, exact
    out_ref[pl.ds(i, 1), :] = row


def transformer_embedding(ids, emb_table, pos_enc, *, rows_per_tile=None):
    """ids: (B, S) int32; emb_table: (V, D) f32; pos_enc: (>=S, D) f32 -> (B, S, D) f32."""
    B, S = ids.shape
    V, D = emb_table.shape
    N = B * S
    scale = math.sqrt(D)

    TR = rows_per_tile if rows_per_tile is not None else S   # rows per output tile
    assert S % TR == 0 and N % TR == 0, "rows_per_tile must divide seq_len"
    n_pos_tiles = S // TR

    ids_flat = ids.reshape(N).astype(jnp.int32)              # scalar prefetch -> SMEM
    emb3 = emb_table.reshape(V, 1, D)                        # gathered block = full last-2 dims
    pos = pos_enc[:S]                                        # (S, D), no B-fold tiling

    kernel = functools.partial(_embed_kernel, scale=scale)

    out_flat = pl.pallas_call(
        kernel,
        out_shape=jax.ShapeDtypeStruct((N, D), jnp.float32),
        grid_spec=pltpu.PrefetchScalarGridSpec(
            num_scalar_prefetch=1,
            grid=(N // TR, TR),                              # row tiles (parallel) x rows-in-tile
            in_specs=[
                # data-dependent gather: DMA exactly one table row per inner step
                pl.BlockSpec((1, 1, D), lambda t, i, ids: (ids[t * TR + i], 0, 0)),
                # positional rows for this tile, read straight from the (S, D) table
                pl.BlockSpec((TR, D), lambda t, i, ids: (t % n_pos_tiles, 0)),
            ],
            out_specs=pl.BlockSpec((TR, D), lambda t, i, ids: (t, 0)),
        ),
        compiler_params=pltpu.CompilerParams(
            dimension_semantics=("parallel", "arbitrary"),   # outer axis feeds both v7x TCs
            vmem_limit_bytes=32 * 1024 * 1024,               # safe on v5e/v6e and 64 MiB v7x
        ),
    )(ids_flat, emb3, pos)

    return out_flat.reshape(B, S, D)


# ---- parameter / buffer construction (plain JAX glue) -----------------------
def make_positional_encoding(max_seq_len, d_embed):
    pos = jnp.arange(max_seq_len, dtype=jnp.float32)[:, None]          # (S, 1)
    div = jnp.exp(jnp.arange(0, d_embed, 2, dtype=jnp.float32)
                  * -(math.log(10000.0) / d_embed))                    # (D/2,)
    enc = jnp.zeros((max_seq_len, d_embed), dtype=jnp.float32)
    enc = enc.at[:, 0::2].set(jnp.sin(pos * div))
    enc = enc.at[:, 1::2].set(jnp.cos(pos * div))
    return enc


if __name__ == "__main__":
    key = jax.random.PRNGKey(0)
    k_emb, k_ids = jax.random.split(key)

    # nn.Embedding default init: N(0, 1)
    emb_table = jax.random.normal(k_emb, (VOCAB, D_EMBED), dtype=jnp.float32)
    pos_enc = make_positional_encoding(SEQ_LEN, D_EMBED)
    ids = jax.random.randint(k_ids, (BATCH, SEQ_LEN), 0, VOCAB, dtype=jnp.int32)

    out = transformer_embedding(ids, emb_table, pos_enc)
    out = jax.block_until_ready(out)

    # reference (pure JAX) check
    ref = emb_table[ids] * math.sqrt(D_EMBED) + pos_enc[None, :, :]
    assert out.shape == (BATCH, SEQ_LEN, D_EMBED)
    assert jnp.allclose(out, ref, atol=1e-5, rtol=1e-5), "mismatch vs reference"

    print("KERNEL_OK")
</pallas_src>

<mosaic_0001>
module attributes {stable_mosaic.version = 11 : i64} {
  func.func @_embed_kernel(%arg0: i32, %arg1: i32, %arg2: memref<16xi32, #tpu.memory_space<smem>>, %arg3: memref<1x1x32xf32, #tpu.memory_space<vmem>>, %arg4: memref<8x32xf32, #tpu.memory_space<vmem>>, %arg5: memref<8x32xf32, #tpu.memory_space<vmem>>) attributes {dimension_semantics = [#tpu.dimension_semantics<parallel>, #tpu.dimension_semantics<arbitrary>], iteration_bounds = array<i64: 2, 8>, scalar_prefetch = 1 : i64, scratch_operands = 0 : i64, tpu.core_type = #tpu.core_type<tc>, window_params = [{transform_indices = @transform_0, window_bounds = array<i64: 1, 1, 32>}, {transform_indices = @transform_1, window_bounds = array<i64: 8, 32>}, {transform_indices = @transform_2, window_bounds = array<i64: 8, 32>}]} {
    %c0 = arith.constant 0 : index
    %c0_0 = arith.constant 0 : index
    %c0_1 = arith.constant 0 : index
    %0 = vector.load %arg3[%c0, %c0_0, %c0_1] : memref<1x1x32xf32, #tpu.memory_space<vmem>>, vector<1x1x32xf32>
    %1 = vector.shape_cast %0 : vector<1x1x32xf32> to vector<1x32xf32>
    %cst = arith.constant 5.65685415 : f32
    %2 = vector.broadcast %cst : f32 to vector<1x32xf32>
    %3 = arith.mulf %1, %2 : vector<1x32xf32>
    %4 = arith.index_cast %arg1 : i32 to index
    %c0_2 = arith.constant 0 : index
    %5 = vector.load %arg4[%4, %c0_2] : memref<8x32xf32, #tpu.memory_space<vmem>>, vector<1x32xf32>
    %6 = arith.addf %3, %5 : vector<1x32xf32>
    %7 = arith.index_cast %arg1 : i32 to index
    %c0_3 = arith.constant 0 : index
    %8 = vector.load %arg5[%7, %c0_3] : memref<8x32xf32, #tpu.memory_space<vmem>>, vector<1x32xf32>
    tpu.vector_store %arg5[%7, %c0_3], %6 {strides = array<i32>} : memref<8x32xf32, #tpu.memory_space<vmem>>, vector<1x32xf32>,
    return
  }
  func.func @transform_0(%arg0: i32, %arg1: i32, %arg2: memref<16xi32, #tpu.memory_space<smem>>) -> (i32, i32, i32) {
    %c8_i32 = arith.constant 8 : i32
    %0 = arith.muli %arg0, %c8_i32 : i32
    %1 = arith.addi %0, %arg1 : i32
    %2 = arith.index_cast %1 : i32 to index
    %3 = memref.load %arg2[%2] : memref<16xi32, #tpu.memory_space<smem>>
    %c0_i32 = arith.constant 0 : i32
    %c0_i32_0 = arith.constant 0 : i32
    %c0_i32_1 = arith.constant 0 : i32
    return %3, %c0_i32, %c0_i32_0 : i32, i32, i32
  }
  func.func @transform_1(%arg0: i32, %arg1: i32, %arg2: memref<16xi32, #tpu.memory_space<smem>>) -> (i32, i32) {
    %c1_i32 = arith.constant 1 : i32
    %c0_i32 = arith.constant 0 : i32
    %0 = arith.cmpi eq, %c1_i32, %c0_i32 : i32
    %c1_i32_0 = arith.constant 1 : i32
    %1 = arith.select %0, %c1_i32_0, %c1_i32 : i32
    %2 = arith.remsi %arg0, %1 : i32
    %c0_i32_1 = arith.constant 0 : i32
    %3 = arith.cmpi ne, %2, %c0_i32_1 : i32
    %c0_i32_2 = arith.constant 0 : i32
    %4 = arith.cmpi slt, %2, %c0_i32_2 : i32
    %c0_i32_3 = arith.constant 0 : i32
    %5 = arith.cmpi slt, %1, %c0_i32_3 : i32
    %6 = arith.xori %4, %5 : i1
    %7 = arith.andi %6, %3 : i1
    %8 = arith.addi %2, %1 : i32
    %9 = arith.select %7, %8, %2 : i32
    %c0_i32_4 = arith.constant 0 : i32
    %c0_i32_5 = arith.constant 0 : i32
    return %9, %c0_i32_4 : i32, i32
  }
  func.func @transform_2(%arg0: i32, %arg1: i32, %arg2: memref<16xi32, #tpu.memory_space<smem>>) -> (i32, i32) {
    %c0_i32 = arith.constant 0 : i32
    %c0_i32_0 = arith.constant 0 : i32
    return %arg0, %c0_i32 : i32, i32
  }
}

</mosaic_0001>

<bundles_post_ra>
// kernel: tpu_custom_call.1
= control target key start
LH: loop header
LB: loop body
LE: loop exit
PB: predicated region body
PF: predicated region fallthrough
CT: control target
= control target key end

     0   :  { %s466_s15 = smov [#allocation3]   ;;  %s611_s0 = inlined_call_operand.vmem [shape: s32[16], index: 0, kind: input, shape index: {}]   ;;  %s612_s1 = inlined_call_operand.vmem [shape: f32[64,1,32], index: 1, kind: input, shape index: {}]   ;;  %s613_s2 = inlined_call_operand.vmem [shape: f32[8,32], index: 2, kind: input, shape index: {}]   ;;  %s614_s3 = inlined_call_operand.hbm [shape: f32[16,32], index: 3, kind: output, shape index: {}]  }
   0x1   :  { %s9_s14 = sshll.u32 %s611_s0, 4  ;;  %s10_s14 = int_to_ptr.vmem [resolvable:$true] %s9_s14 }
   0x2   :  { %12 = dma.vmem_to_smem %s10_s14, 16, %s466_s15, [#allocation2] }
   0x3   :  { %428 = dma.done.wait [#allocation2], 16 }
   0x4   :  { %429 = vsyncadd [#allocation2], 4294967280 }
   0x5   :  { %15 = sfence }
   0x6   :  { %16 = vsyncpa [#allocation5], 0 }
   0x7   :  { %18 = vsyncpa [#allocation5 + $0x1], 0  ;;  %s490_s16 = smov 0   ;;  %s492_s17 = smov 0  }
   0x8   :  { %s494_s18 = smov 0   ;;  %s496_s19 = smov 0  }
   0x9   :  { %s498_s20 = smov 0   ;;  %s500_s21 = smov 0  }
   0xa   :  { %s502_s0 = smov 0   ;;  %s504_s22 = smov 0  }
   0xb LB: > { %s271_s23 = sadd.s32 4294967295, %s464_s22   ;;  %s272_s24 = sadd.s32 4294967294, %s464_s22   ;;  %s464_s22 = sphi %s504_s22, %s24_s22   ;;  %s460_s0 = sphi %s502_s0, %s626_s0   ;;  %s456_s21 = sphi %s500_s21, %s625_s21   ;;  %s452_s20 = sphi %s498_s20, %s624_s20   ;;  %s448_s19 = sphi %s496_s19, %s623_s19   ;;  %s444_s18 = sphi %s494_s18, %s622_s18   ;;  %s440_s17 = sphi %s492_s17, %s621_s17   ;;  %s436_s16 = sphi %s490_s16, %s620_s16  }
   0xc   : > { %s33_s25 = sadd.s32 1, %s456_s21  ;;  %s36_s26 = sadd.s32 1, %s460_s0 }
   0xd   : > { %p34_p0 = scmp.ge.s32.totalorder %s33_s25, 8  ;;  %p106_p1 = scmp.ne.s32.totalorder %s444_s18, %s440_s17 }
   0xe   : > { %p107_p2 = scmp.eq.s32.totalorder %s271_s23, 15  ;;  %p112_p4 = scmp.ne.s32.totalorder %s440_s17, %s436_s16 }
   0xf   : > { %s628_s25 = smov (%p34_p0, %s33_s25), 0  ;;  %s630_s26 = smov (!%p34_p0, %s36_s26), %s460_s0 }
  0x10   : > { %p539_p3 = por %p107_p2, %p106_p1  ;;  %p38_p5 = scmp.ge.s32.totalorder %s630_s26, 2 }
  0x11   : > { %p113_p6 = scmp.eq.s32.totalorder %s272_s24, 15  ;;  %p277_p7 = scmp.ge.s32.totalorder %s464_s22, 1 }
  0x12   : > { %p146_p8 = scmp.lt.s32.totalorder %s464_s22, 17  ;;  %s632_s26 = smov (%p38_p5, %s630_s26), 0 }
  0x13   : > { %617 = sst [smem:[#allocation8_spill]] %s632_s26  ;;  %p549_p9 = por %p113_p6, %p112_p4 }
  0x14   : > { %p147_p10 = pnand %p277_p7, %p146_p8  ;;  %s93_s29 = ssub.s32 %s460_s0, %s632_s26 }
  0x15   : > { %s96_s30 = sadd.s32 1, %s444_s18  ;;  %p94_p11 = scmp.eq.s32.totalorder %s93_s29, 0 }
  0x16   : > { %150 = sbr.rel (%p147_p10) target bundleno = 43 (0x2b), region = 28  ;;  %s279_s5 = sshll.u32 (!%p147_p10), %s452_s20, 3 }
  0x17   : > { %s557_s4 = scalar_select %p94_p11, %s444_s18, %s96_s30  }
  0x18   : > { %s170_s6 = sadd.s32 (!%p147_p10), %s448_s19, %s279_s5  ;;  %s166_s7 = sand.u32 (!%p147_p10), 1, %s440_s17  }
  0x19   : > { %s171_s8 = sld [smem:[#allocation3 + %s170_s6]] (!%p147_p10)  ;;  %s278_s9 = sshll.u32 (!%p147_p10), %s166_s7, 3 }
  0x1a   : > { %s180_s12 = scalar_lea.vmem (!%p147_p10), %s613_s2, %s448_s19  ;;  %s197_s15 = scalar_lea.hbm (!%p147_p10), %s614_s3, %s279_s5 }
  0x1b   : > { %v181_v1 = vld [vmem:[%s180_s12] sm:$0x1]  ;;  %s168_s20 = scalar_lea.vmem [#allocation4], %s278_s9  ;;  %s201_s6 = sshll.u32 %s197_s15, 4  ;;  %vm184_vm0 = vcmask 253952   ;;  %s202_s6 = int_to_ptr.hbm [resolvable:$true] %s201_s6 }
  0x1c   : > { %s199_s30 = sshll.u32 %s168_s20, 4  ;;  %s183_s26 = scalar_lea.vmem %s168_s20, %s448_s19 [#allocation4]  ;;  %s200_s30 = int_to_ptr.vmem [resolvable:$true] %s199_s30 }
  0x1d   : > { %s187_s10 = scalar_lea.sflag [#allocation5], %s166_s7  ;;  %s382_s5 = sshra.s32 %s202_s6, 4  ;;  %s383_s5 = int_to_ptr.hbm [resolvable:$true] %s382_s5 }
  0x1e   : > { %s384_s11 = scalar_lea.hbm %s383_s5, 8  ;;  %s388_s9 = scalar_lea.hbm %s614_s3, 16 }
  0x1f   : > { %p172_p12 = scmp.lt.s32.totalorder %s171_s8, 63  ;;  %p385_p13 = scmp.ne.s32.totalorder %s383_s5, %s384_s11 }
  0x20   : > { %p389_p2 = scmp.lt.s32.totalorder %s383_s5, %s614_s3  ;;  %p390_p4 = scmp.lt.s32.totalorder %s388_s9, %s384_s11 }
  0x21   : > { %s634_s8 = smov (!%p172_p12, %s171_s8), 63  ;;  %p386_p0 = pnand %p385_p13, %p539_p3 }
  0x22   : > { %s174_s29 = scalar_lea.vmem %s612_s1, %s634_s8  ;;  %p391_p5 = por %p390_p4, %p389_p2 }
  0x23   : > { %v178_v0 = vld [vmem:[%s174_s29] sm:$0x1]  ;;  %p387_p1 = pneg %p386_p0 }
  0x24   : > { %v179_v2 = vmul.f32 5.656854, %v178_v0 }
  0x25   : > { %p392_p6 = pnand %p391_p5, %p387_p1 }
  0x26   : > { %v182_v3 = vadd.f32 %v181_v1, %v179_v2 }
  0x28   : > { %185 = vst.msk [vmem:[%s183_s26] sm:$0x1] %vm184_vm0, %v182_v3 }
  0x29   : > { %395 = shalt.err (!%p392_p6)
}
  0x2a   : > { %284 = dma.vmem_to_hbm [thread:$0]  (%p539_p3), %s200_s30, 128, %s202_s6, %s187_s10  }
  0x2b PF: > { %p290_p7 = scmp.ge.s32.totalorder %s464_s22, 2  ;;  %s213_s19 = sand.u32 1, %s436_s16  }
  0x2c   : > { %s214_s26 = scalar_lea.sflag [#allocation5], %s213_s19 }
  0x2d   : > { %p287_p8 = pnand %p290_p7, %p549_p9 }
  0x2f   : > { %p288_p10 = pneg %p287_p8 }
  0x31   : > { %431 = dma.done.wait (%p288_p10), %s214_s26, 128  }
  0x32   : > { %433 = vsyncadd (%p288_p10), %s214_s26, 4294967168  ;;  %s24_s22 = sadd.s32 1, %s464_s22   ;;  %s619_s27 = sld [smem:[#allocation8_spill]] }
  0x33   : > { %p21_p11 = scmp.ge.s32.totalorder %s24_s22, 18   ;;  %s620_s16 = smov %s440_s17 }
  0x34   : > { %s621_s17 = smov %s444_s18  ;;  %s622_s18 = smov %s557_s4 }
  0x35   : > { %s623_s19 = smov %s456_s21  ;;  %s624_s20 = smov %s460_s0 }
  0x36   : > { %s625_s21 = smov %s628_s25  ;;  %23 = sbr.rel (!%p21_p11) target bundleno = 11 (0xb), region = 65 }
  0x38   : > { %s626_s0 = smov %s619_s27 }
  0x3b   :  { %220 = vsyncpa [#allocation5], 1 }
  0x3c   :  { %222 = vsyncpa [#allocation5 + $0x1], 1 }

</bundles_post_ra>
